<compile_context>
chip_gen: v5e
topology: v5e:2x2
jax: 0.10.0
libtpu: 0.0.40
codegen_flags: <defaults>
</compile_context>

<pallas_src>
import functools

import jax
import jax.numpy as jnp
from jax.experimental import pallas as pl
from jax.experimental.pallas import tpu as pltpu

_LANE = 128
_SUBLANE = 8


def _round_up(x, m):
    return (x + m - 1) // m * m


def _round_down(x, m):
    return x // m * m


def _vmem_budget():
    """(vmem_limit_bytes, target input-block bytes) derived from the target chip."""
    try:
        cap = int(pltpu.get_tpu_info().vmem_capacity_bytes)
    except Exception:
        cap = 64 * 1024 * 1024                      # conservative default (v7x)
    usable = cap - 16 * 1024 * 1024                 # headroom for compiler scratch
    vmem_limit = min(usable, 96 * 1024 * 1024)      # 96 MiB on v5e/v6e, 48 MiB on v7x
    # input block target; in+out double buffers + centered temporaries ~ 6-8x a block
    block_target = min(12 * 1024 * 1024, usable // 8)   # ~12 MiB v5e/v6e, ~6 MiB v7x
    return vmem_limit, block_target


# --------------------------------------------------------------------------- kernels
def _cbn_fused_kernel(x_ref, w2_ref, b_ref, o_ref, *, n_rows):
    """Fused stats + normalize for one channel-lane tile (full batch resident).

    x_ref : [N, L] f32, re/im interleaved (lane 2c = Re, 2c+1 = Im), L = 2*ctile
    w2_ref: [1, L]  f32, weight duplicated onto both lanes of each channel pair
    b_ref : [1, L]  f32, interleaved complex bias
    o_ref : [N, L]  f32, interleaved output
    """
    x = x_ref[...]
    mean = jnp.sum(x, axis=0, keepdims=True) * jnp.float32(1.0 / n_rows)    # [1, L]
    d = x - mean

    # per-lane centered sum of squares, then combine the (re, im) lane pair so that
    # BOTH lanes of channel c hold sum_n |x[n,c] - mean[c]|^2.  Two XLU rotates + a
    # parity select; wrap-around values are never selected, and pairs never straddle
    # a block boundary (block lane offsets are even).
    s = jnp.sum(d * d, axis=0, keepdims=True)                               # [1, L]
    lanes = s.shape[-1]
    prev = pltpu.roll(s, 1, axis=1)            # prev[i] = s[i-1]
    nxt = pltpu.roll(s, lanes - 1, axis=1)     # nxt[i]  = s[i+1]
    lane_idx = jax.lax.broadcasted_iota(jnp.int32, s.shape, 1)
    is_odd = jnp.bitwise_and(lane_idx, 1) == 1
    sumsq = s + jnp.where(is_odd, prev, nxt)                                # [1, L]

    var = sumsq * jnp.float32(1.0 / (n_rows - 1))   # unbiased, real (torch.var)
    # no eps: the torch module divides by sqrt(var) directly
    scale = jax.lax.rsqrt(var) * w2_ref[...]        # rsqrt on the EUP; weight folded in
    o_ref[...] = d * scale + b_ref[...]


def _cbn_stats_kernel(x_ref, sum_ref, sq_ref, *, n_rows, rows_per_block):
    """Phase 1 of the large-N path: accumulate per-lane sum / sum-of-squares."""
    n_idx = pl.program_id(1)

    @pl.when(n_idx == 0)
    def _():
        sum_ref[...] = jnp.zeros_like(sum_ref)
        sq_ref[...] = jnp.zeros_like(sq_ref)

    x = x_ref[...]
    row = n_idx * rows_per_block + jax.lax.broadcasted_iota(jnp.int32, x.shape, 0)
    x = jnp.where(row < n_rows, x, 0.0)        # mask rows past the batch (block padding)
    sum_ref[...] += jnp.sum(x, axis=0, keepdims=True)
    sq_ref[...] += jnp.sum(x * x, axis=0, keepdims=True)


def _cbn_apply_kernel(x_ref, scale_ref, shift_ref, o_ref):
    """Phase 2 of the large-N path: y = x * scale + shift (all interleaved lanes)."""
    o_ref[...] = x_ref[...] * scale_ref[...] + shift_ref[...]


# --------------------------------------------------------------------------- wrapper
def complex_batchnorm_var(x, weight, bias, *, force_two_phase=False):
    """Forward of Complex_BatchNorm_var (training, first batch).

    x: complex64 [N, C]; weight: float32 [C]; bias: complex64 [C] -> complex64 [N, C]
    """
    n_rows, num_ch = x.shape
    if n_rows < 2:
        raise ValueError("Complex_BatchNorm_var needs at least 2 samples (unbiased var).")
    lanes = 2 * num_ch

    # Interleaved f32 views (lane order == complex64 memory order).  With
    # allow_input_fusion XLA may fuse these producers into the pallas_call input
    # instead of materializing them in HBM.
    x_f = jnp.stack([jnp.real(x), jnp.imag(x)], axis=-1).astype(jnp.float32)
    x_f = x_f.reshape(n_rows, lanes)
    b_f = jnp.stack([jnp.real(bias), jnp.imag(bias)], axis=-1).astype(jnp.float32)
    b_f = b_f.reshape(1, lanes)
    w_dup = jnp.repeat(weight.astype(jnp.float32), 2).reshape(1, lanes)

    vmem_limit, block_target = _vmem_budget()

    # Fused single-pass path is usable when a full-batch block at the narrowest legal
    # lane tile still fits the per-block byte target.
    fused_fits = n_rows * min(lanes, _LANE) * 4 <= block_target

    if fused_fits and not force_two_phase:
        # ---- lane tile: cap by VMEM budget, but prefer >=2 channel blocks (v7x has
        # two TensorCores) as long as each block keeps >=256 lanes for DMA efficiency.
        if lanes <= 256:
            tl = lanes                                       # full-dim block is legal
        else:
            by_budget = _round_down(block_target // (n_rows * 4), _LANE)
            by_split = max(256, _round_up(pl.cdiv(lanes, 2), _LANE))
            tl = max(_LANE, min(by_budget, by_split, _round_up(lanes, _LANE)))
        grid = (pl.cdiv(lanes, tl),)

        y_f = pl.pallas_call(
            functools.partial(_cbn_fused_kernel, n_rows=n_rows),
            out_shape=jax.ShapeDtypeStruct((n_rows, lanes), jnp.float32),
            grid=grid,
            in_specs=[
                pl.BlockSpec((n_rows, tl), lambda c: (0, c)),
                pl.BlockSpec((1, tl), lambda c: (0, c)),
                pl.BlockSpec((1, tl), lambda c: (0, c)),
            ],
            out_specs=pl.BlockSpec((n_rows, tl), lambda c: (0, c)),
            compiler_params=pltpu.CompilerParams(
                dimension_semantics=("parallel",),
                vmem_limit_bytes=vmem_limit,
                allow_input_fusion=[True, True, True],
            ),
        )(x_f, w_dup, b_f)
    else:
        # -------- two-phase streaming path for batches too large for one block -----
        if lanes <= 256:
            tl = lanes
        else:
            tl = min(512, max(256, _round_up(pl.cdiv(lanes, 2), _LANE)),
                     _round_up(lanes, _LANE))
        rows_by_budget = _round_down(max(block_target // (tl * 4), _SUBLANE), _SUBLANE)
        tn = max(_SUBLANE, min(rows_by_budget,
                               _round_down(max(n_rows, _SUBLANE), _SUBLANE)))
        cg = pl.cdiv(lanes, tl)
        ng = pl.cdiv(n_rows, tn)

        sums, sqs = pl.pallas_call(
            functools.partial(_cbn_stats_kernel, n_rows=n_rows, rows_per_block=tn),
            out_shape=(jax.ShapeDtypeStruct((1, lanes), jnp.float32),
                       jax.ShapeDtypeStruct((1, lanes), jnp.float32)),
            grid=(cg, ng),
            in_specs=[pl.BlockSpec((tn, tl), lambda c, n: (n, c))],
            out_specs=(pl.BlockSpec((1, tl), lambda c, n: (0, c)),
                       pl.BlockSpec((1, tl), lambda c, n: (0, c))),
            compiler_params=pltpu.CompilerParams(
                dimension_semantics=("parallel", "arbitrary"),
                vmem_limit_bytes=vmem_limit,
                allow_input_fusion=[True],
            ),
        )(x_f)

        # Tiny per-channel statistics math in plain JAX ([1, 2C] vectors).
        mean_i = sums / jnp.float32(n_rows)                        # interleaved mean
        sq_c = sqs.reshape(num_ch, 2).sum(axis=-1)                 # sum |x|^2 per channel
        m2_c = (mean_i.reshape(num_ch, 2) ** 2).sum(axis=-1)       # |mean|^2 per channel
        var_c = jnp.maximum(sq_c - n_rows * m2_c, 0.0) / jnp.float32(n_rows - 1)
        scale_c = jax.lax.rsqrt(var_c) * weight.astype(jnp.float32)
        scale_i = jnp.repeat(scale_c, 2).reshape(1, lanes)
        shift_i = b_f - mean_i * scale_i                           # (x - m)*s + b == x*s + shift

        y_f = pl.pallas_call(
            _cbn_apply_kernel,
            out_shape=jax.ShapeDtypeStruct((n_rows, lanes), jnp.float32),
            grid=(cg, ng),
            in_specs=[pl.BlockSpec((tn, tl), lambda c, n: (n, c)),
                      pl.BlockSpec((1, tl), lambda c, n: (0, c)),
                      pl.BlockSpec((1, tl), lambda c, n: (0, c))],
            out_specs=pl.BlockSpec((tn, tl), lambda c, n: (n, c)),
            compiler_params=pltpu.CompilerParams(
                dimension_semantics=("parallel", "parallel"),
                vmem_limit_bytes=vmem_limit,
                allow_input_fusion=[True, True, True],
            ),
        )(x_f, scale_i, shift_i)

    y = y_f.reshape(n_rows, num_ch, 2)
    return jax.lax.complex(y[..., 0], y[..., 1])


# ------------------------------------------------------------------------- reference
def _reference(x, weight, bias):
    # pure-JAX reference mirroring the PyTorch forward (training, first_run)
    n = x.shape[0]
    ev = jnp.mean(x, axis=0, keepdims=True)
    d = x - ev
    var = jnp.sum(jnp.real(d) ** 2 + jnp.imag(d) ** 2, axis=0, keepdims=True) / (n - 1)
    return d / jnp.sqrt(var) * weight + bias


if __name__ == "__main__":
    fwd = jax.jit(complex_batchnorm_var, static_argnames=("force_two_phase",))

    key = jax.random.PRNGKey(0)
    kxr, kxi, kw, kbr, kbi = jax.random.split(key, 5)

    # ---- main (fused single-pass) path: batch=8, channels=64 -> 128 lanes ----
    N, C = 8, 64
    x = (jax.random.normal(kxr, (N, C), jnp.float32)
         + 1j * jax.random.normal(kxi, (N, C), jnp.float32)).astype(jnp.complex64)
    weight = jax.random.normal(kw, (C,), jnp.float32) * 0.5 + 1.0
    bias = ((jax.random.normal(kbr, (C,), jnp.float32)
             + 1j * jax.random.normal(kbi, (C,), jnp.float32)) * 0.1).astype(jnp.complex64)

    out = jax.block_until_ready(fwd(x, weight, bias))
    ref = _reference(x, weight, bias)
    assert out.shape == (N, C) and out.dtype == jnp.complex64
    assert jnp.allclose(out, ref, atol=1e-5, rtol=1e-5), "fused path mismatch vs reference"

    # ---- also exercise the two-phase streaming path (used for very large N) at a
    # small, deliberately ragged shape (N not a multiple of the row tile) ----
    N2, C2 = 12, 48
    k2 = jax.random.split(jax.random.PRNGKey(1), 5)
    x2 = (jax.random.normal(k2[0], (N2, C2), jnp.float32)
          + 1j * jax.random.normal(k2[1], (N2, C2), jnp.float32)).astype(jnp.complex64)
    weight2 = jax.random.normal(k2[2], (C2,), jnp.float32) * 0.5 + 1.0
    bias2 = ((jax.random.normal(k2[3], (C2,), jnp.float32)
              + 1j * jax.random.normal(k2[4], (C2,), jnp.float32)) * 0.1).astype(jnp.complex64)

    out2 = jax.block_until_ready(fwd(x2, weight2, bias2, force_two_phase=True))
    ref2 = _reference(x2, weight2, bias2)
    assert jnp.allclose(out2, ref2, atol=1e-4, rtol=1e-4), "two-phase path mismatch vs reference"

    print("KERNEL_OK")
</pallas_src>

<mosaic_0001>
module attributes {stable_mosaic.version = 11 : i64} {
  func.func @_cbn_fused_kernel(%arg0: i32, %arg1: memref<8x128xf32, #tpu.memory_space<vmem>>, %arg2: memref<1x128xf32, #tpu.memory_space<vmem>>, %arg3: memref<1x128xf32, #tpu.memory_space<vmem>>, %arg4: memref<8x128xf32, #tpu.memory_space<vmem>>) attributes {dimension_semantics = [#tpu.dimension_semantics<parallel>], iteration_bounds = array<i64: 1>, scalar_prefetch = 0 : i64, scratch_operands = 0 : i64, tpu.core_type = #tpu.core_type<tc>, window_params = [{transform_indices = @transform_0, window_bounds = array<i64: 8, 128>}, {transform_indices = @transform_1, window_bounds = array<i64: 1, 128>}, {transform_indices = @transform_2, window_bounds = array<i64: 1, 128>}, {transform_indices = @transform_3, window_bounds = array<i64: 8, 128>}]} {
    %c0 = arith.constant 0 : index
    %c0_0 = arith.constant 0 : index
    %0 = vector.load %arg1[%c0, %c0_0] : memref<8x128xf32, #tpu.memory_space<vmem>>, vector<8x128xf32>
    %cst = arith.constant dense<0.000000e+00> : vector<128xf32>
    %1 = vector.multi_reduction <add>, %0, %cst [0] : vector<8x128xf32> to vector<128xf32>
    %2 = vector.shape_cast %1 : vector<128xf32> to vector<1x128xf32>
    %cst_1 = arith.constant 1.250000e-01 : f32
    %3 = vector.broadcast %cst_1 : f32 to vector<1x128xf32>
    %4 = arith.mulf %2, %3 : vector<1x128xf32>
    %5 = vector.broadcast %4 : vector<1x128xf32> to vector<8x128xf32>
    %6 = arith.subf %0, %5 : vector<8x128xf32>
    %7 = arith.mulf %6, %6 : vector<8x128xf32>
    %cst_2 = arith.constant dense<0.000000e+00> : vector<128xf32>
    %8 = vector.multi_reduction <add>, %7, %cst_2 [0] : vector<8x128xf32> to vector<128xf32>
    %9 = vector.shape_cast %8 : vector<128xf32> to vector<1x128xf32>
    %c1_i32 = arith.constant 1 : i32
    %10 = tpu.dynamic_rotate %9 by %c1_i32 dim 1 : vector<1x128xf32>, i32 -> vector<1x128xf32>
    %c127_i32 = arith.constant 127 : i32
    %11 = tpu.dynamic_rotate %9 by %c127_i32 dim 1 : vector<1x128xf32>, i32 -> vector<1x128xf32>
    %12 = tpu.iota {dimensions = array<i32: 1>} : vector<1x128xi32>
    %c1_i32_3 = arith.constant 1 : i32
    %13 = vector.broadcast %c1_i32_3 : i32 to vector<1x128xi32>
    %14 = arith.andi %12, %13 : vector<1x128xi32>
    %c1_i32_4 = arith.constant 1 : i32
    %15 = vector.broadcast %c1_i32_4 : i32 to vector<1x128xi32>
    %16 = arith.cmpi eq, %14, %15 : vector<1x128xi32>
    %17 = arith.select %16, %10, %11 : vector<1x128xi1>, vector<1x128xf32>
    %18 = arith.addf %9, %17 : vector<1x128xf32>
    %cst_5 = arith.constant 0.142857149 : f32
    %19 = vector.broadcast %cst_5 : f32 to vector<1x128xf32>
    %20 = arith.mulf %18, %19 : vector<1x128xf32>
    %21 = math.rsqrt %20 : vector<1x128xf32>
    %c0_6 = arith.constant 0 : index
    %c0_7 = arith.constant 0 : index
    %22 = vector.load %arg2[%c0_6, %c0_7] : memref<1x128xf32, #tpu.memory_space<vmem>>, vector<1x128xf32>
    %23 = arith.mulf %21, %22 : vector<1x128xf32>
    %24 = vector.broadcast %23 : vector<1x128xf32> to vector<8x128xf32>
    %25 = arith.mulf %6, %24 : vector<8x128xf32>
    %c0_8 = arith.constant 0 : index
    %c0_9 = arith.constant 0 : index
    %26 = vector.load %arg3[%c0_8, %c0_9] : memref<1x128xf32, #tpu.memory_space<vmem>>, vector<1x128xf32>
    %27 = vector.broadcast %26 : vector<1x128xf32> to vector<8x128xf32>
    %28 = arith.addf %25, %27 : vector<8x128xf32>
    %c0_10 = arith.constant 0 : index
    %c0_11 = arith.constant 0 : index
    %29 = vector.load %arg4[%c0_10, %c0_11] : memref<8x128xf32, #tpu.memory_space<vmem>>, vector<8x128xf32>
    tpu.vector_store %arg4[%c0_10, %c0_11], %28 {strides = array<i32>} : memref<8x128xf32, #tpu.memory_space<vmem>>, vector<8x128xf32>,
    return
  }
  func.func @transform_0(%arg0: i32) -> (i32, i32) {
    %c0_i32 = arith.constant 0 : i32
    %c0_i32_0 = arith.constant 0 : i32
    return %c0_i32, %arg0 : i32, i32
  }
  func.func @transform_1(%arg0: i32) -> (i32, i32) {
    %c0_i32 = arith.constant 0 : i32
    %c0_i32_0 = arith.constant 0 : i32
    return %c0_i32, %arg0 : i32, i32
  }
  func.func @transform_2(%arg0: i32) -> (i32, i32) {
    %c0_i32 = arith.constant 0 : i32
    %c0_i32_0 = arith.constant 0 : i32
    return %c0_i32, %arg0 : i32, i32
  }
  func.func @transform_3(%arg0: i32) -> (i32, i32) {
    %c0_i32 = arith.constant 0 : i32
    %c0_i32_0 = arith.constant 0 : i32
    return %c0_i32, %arg0 : i32, i32
  }
}

</mosaic_0001>

<bundles_post_ra>
// kernel: custom-call.1
= control target key start
LH: loop header
LB: loop body
LE: loop exit
PB: predicated region body
PF: predicated region fallthrough
CT: control target
= control target key end

     0   :  { %s56_s0 = inlined_call_operand.hbm [shape: c64[8,64], index: 0, kind: input, shape index: {}]   ;;  %s57_s1 = inlined_call_operand.vmem [shape: f32[8,64], index: 1, kind: output, shape index: {}]  }
   0x1   :  { %s2_s8 = scalar_lea.hbm %s56_s0, 8 }
   0x2   :  { %3 = vsyncpa [#allocation0], 0  ;;  %s5_s9 = sshll.u32 %s2_s8, 4  ;;  %s7_s12 = sshll.u32 %s57_s1, 4  ;;  %s6_s9 = int_to_ptr.hbm [resolvable:$true] %s5_s9  ;;  %s8_s12 = int_to_ptr.vmem [resolvable:$true] %s7_s12 }
   0x3   :  { %10 = dma.hbm_to_vmem [thread:$0]  %s6_s9, 128, %s8_s12, [#allocation0] }
   0x4   :  { %38 = dma.done.wait [#allocation0], 128  }
   0x5   :  { %39 = vsyncadd [#allocation0], 4294967168 }
   0x6   :  { %13 = vsyncpa [#allocation0], 1 }

// kernel: custom-call.2
= control target key start
LH: loop header
LB: loop body
LE: loop exit
PB: predicated region body
PF: predicated region fallthrough
CT: control target
= control target key end

     0   :  { %2 = vsyncpa [#allocation0], 0  ;;  %s55_s0 = inlined_call_operand.hbm [shape: c64[64], index: 0, kind: input, shape index: {}]   ;;  %s56_s1 = inlined_call_operand.vmem [shape: f32[64], index: 1, kind: output, shape index: {}]  }
   0x1   :  { %s4_s8 = sshll.u32 %s55_s0, 4  ;;  %s6_s11 = sshll.u32 %s56_s1, 4  ;;  %s5_s8 = int_to_ptr.hbm [resolvable:$true] %s4_s8  ;;  %s7_s11 = int_to_ptr.vmem [resolvable:$true] %s6_s11 }
   0x2   :  { %9 = dma.hbm_to_vmem [thread:$0]  %s5_s8, 16, %s7_s11, [#allocation0] }
   0x3   :  { %37 = dma.done.wait [#allocation0], 16  }
   0x4   :  { %38 = vsyncadd [#allocation0], 4294967280 }
   0x5   :  { %12 = vsyncpa [#allocation0], 1 }

// kernel: custom-call.3
= control target key start
LH: loop header
LB: loop body
LE: loop exit
PB: predicated region body
PF: predicated region fallthrough
CT: control target
= control target key end

     0   :  { %s56_s0 = inlined_call_operand.hbm [shape: c64[64], index: 0, kind: input, shape index: {}]   ;;  %s57_s1 = inlined_call_operand.vmem [shape: f32[64], index: 1, kind: output, shape index: {}]  }
   0x1   :  { %s2_s8 = scalar_lea.hbm %s56_s0, 1 }
   0x2   :  { %3 = vsyncpa [#allocation0], 0  ;;  %s5_s9 = sshll.u32 %s2_s8, 4  ;;  %s7_s12 = sshll.u32 %s57_s1, 4  ;;  %s6_s9 = int_to_ptr.hbm [resolvable:$true] %s5_s9  ;;  %s8_s12 = int_to_ptr.vmem [resolvable:$true] %s7_s12 }
   0x3   :  { %10 = dma.hbm_to_vmem [thread:$0]  %s6_s9, 16, %s8_s12, [#allocation0] }
   0x4   :  { %38 = dma.done.wait [#allocation0], 16  }
   0x5   :  { %39 = vsyncadd [#allocation0], 4294967280 }
   0x6   :  { %13 = vsyncpa [#allocation0], 1 }

// kernel: custom-call
= control target key start
LH: loop header
LB: loop body
LE: loop exit
PB: predicated region body
PF: predicated region fallthrough
CT: control target
= control target key end

     0   :  { %2 = vsyncpa [#allocation0], 0  ;;  %s55_s0 = inlined_call_operand.hbm [shape: c64[8,64], index: 0, kind: input, shape index: {}]   ;;  %s56_s1 = inlined_call_operand.vmem [shape: f32[8,64], index: 1, kind: output, shape index: {}]  }
   0x1   :  { %s4_s8 = sshll.u32 %s55_s0, 4  ;;  %s6_s11 = sshll.u32 %s56_s1, 4  ;;  %s5_s8 = int_to_ptr.hbm [resolvable:$true] %s4_s8  ;;  %s7_s11 = int_to_ptr.vmem [resolvable:$true] %s6_s11 }
   0x2   :  { %9 = dma.hbm_to_vmem [thread:$0]  %s5_s8, 128, %s7_s11, [#allocation0] }
   0x3   :  { %37 = dma.done.wait [#allocation0], 128  }
   0x4   :  { %38 = vsyncadd [#allocation0], 4294967168 }
   0x5   :  { %12 = vsyncpa [#allocation0], 1 }

// kernel: custom-call.4
= control target key start
LH: loop header
LB: loop body
LE: loop exit
PB: predicated region body
PF: predicated region fallthrough
CT: control target
= control target key end

     0   :  { %s211_s0 = inlined_call_operand.vmem [shape: f32[8,64], index: 0, kind: input, shape index: {}]   ;;  %s212_s2 = inlined_call_operand.vmem [shape: c64[8,64], index: 2, kind: output, shape index: {}]   ;;  %s213_s1 = inlined_call_operand.vmem [shape: f32[8,64], index: 1, kind: input, shape index: {}]  }
   0x1   :  { %v4_v0 = vld [vmem:[%s211_s0] sm:$0xff]  ;;  %v71_v1 = vld [vmem:[%s211_s0 + $0x8] sm:$0xff]  ;;  %v73_v2 = vld [vmem:[%s211_s0 + $0x10] sm:$0xff] }
   0x2   :  { %5 = vst [vmem:[%s212_s2] sm:$0xff] %v4_v0  ;;  %v75_v3 = vld [vmem:[%s211_s0 + $0x18] sm:$0xff]  ;;  %v77_v4 = vld [vmem:[%s211_s0 + $0x20] sm:$0xff]  ;;  %v79_v5 = vld [vmem:[%s211_s0 + $0x28] sm:$0xff] }
   0x3   :  { %72 = vst [vmem:[%s212_s2 + $0x8] sm:$0xff] %v71_v1  ;;  %v81_v6 = vld [vmem:[%s211_s0 + $0x30] sm:$0xff]  ;;  %v83_v7 = vld [vmem:[%s211_s0 + $0x38] sm:$0xff]  ;;  %v34_v8 = vld [vmem:[%s213_s1] sm:$0xff] }
   0x4   :  { %74 = vst [vmem:[%s212_s2 + $0x10] sm:$0xff] %v73_v2  ;;  %v86_v9 = vld [vmem:[%s213_s1 + $0x8] sm:$0xff]  ;;  %v88_v10 = vld [vmem:[%s213_s1 + $0x10] sm:$0xff]  ;;  %v90_v11 = vld [vmem:[%s213_s1 + $0x18] sm:$0xff] }
   0x5   :  { %76 = vst [vmem:[%s212_s2 + $0x18] sm:$0xff] %v75_v3  ;;  %v92_v12 = vld [vmem:[%s213_s1 + $0x20] sm:$0xff]  ;;  %v94_v13 = vld [vmem:[%s213_s1 + $0x28] sm:$0xff]  ;;  %v96_v14 = vld [vmem:[%s213_s1 + $0x30] sm:$0xff] }
   0x6   :  { %78 = vst [vmem:[%s212_s2 + $0x20] sm:$0xff] %v77_v4  ;;  %v98_v15 = vld [vmem:[%s213_s1 + $0x38] sm:$0xff] }
   0x7   :  { %80 = vst [vmem:[%s212_s2 + $0x28] sm:$0xff] %v79_v5 }
   0x8   :  { %82 = vst [vmem:[%s212_s2 + $0x30] sm:$0xff] %v81_v6 }
   0x9   :  { %84 = vst [vmem:[%s212_s2 + $0x38] sm:$0xff] %v83_v7 }
   0xa   :  { %85 = vst [vmem:[%s212_s2 + $0x40] sm:$0xff] %v34_v8 }
   0xb   :  { %87 = vst [vmem:[%s212_s2 + $0x48] sm:$0xff] %v86_v9 }
   0xc   :  { %89 = vst [vmem:[%s212_s2 + $0x50] sm:$0xff] %v88_v10 }
   0xd   :  { %91 = vst [vmem:[%s212_s2 + $0x58] sm:$0xff] %v90_v11 }
   0xe   :  { %93 = vst [vmem:[%s212_s2 + $0x60] sm:$0xff] %v92_v12 }
   0xf   :  { %95 = vst [vmem:[%s212_s2 + $0x68] sm:$0xff] %v94_v13 }
  0x10   :  { %97 = vst [vmem:[%s212_s2 + $0x70] sm:$0xff] %v96_v14 }
  0x11   :  { %99 = vst [vmem:[%s212_s2 + $0x78] sm:$0xff] %v98_v15 }

// kernel: complex_batchnorm_var.1
= control target key start
LH: loop header
LB: loop body
LE: loop exit
PB: predicated region body
PF: predicated region fallthrough
CT: control target
= control target key end

     0   :  { %s70_s14 = smov 1   ;;  %s71_s15 = smov 127   ;;  %v34_v16 = vlaneseq  ;;  %s104_s0 = inlined_call_operand.vmem [shape: f32[8,128], index: 0, kind: input, shape index: {}]   ;;  %s105_s2 = inlined_call_operand.vmem [shape: f32[1,128], index: 2, kind: input, shape index: {}]   ;;  %s106_s1 = inlined_call_operand.vmem [shape: f32[1,128], index: 1, kind: input, shape index: {}]   ;;  %s107_s3 = inlined_call_operand.vmem [shape: f32[8,128], index: 3, kind: output, shape index: {}]  }
   0x1   :  { %v14_v0 = vld [vmem:[%s104_s0] sm:$0xff] }
   0x2   :  { %v15_v1 = vrot.slane %v14_v0, 4  ;;  %v35_v17 = vand.u32 127, %v34_v16  ;;  %v51_v29 = vld [vmem:[%s106_s1] sm:$0x1] }
   0x3   :  { %v67_v33 = vld [vmem:[%s105_s2] ss:$0 sm:$0xff] }
   0x4   :  { %v16_v2 = vadd.f32 %v15_v1, %v14_v0  ;;  %v36_v19 = vand.u32 1, %v35_v17 }
   0x6   :  { %v17_v3 = vrot.slane %v16_v2, 2  ;;  %vm37_vm0 = vcmp.eq.s32.totalorder %v36_v19, 1 }
   0x8   :  { %v18_v4 = vadd.f32 %v17_v3, %v16_v2 }
   0xa   :  { %v19_v5 = vrot.slane %v18_v4, 1 }
   0xc   :  { %v20_v6 = vadd.f32 %v19_v5, %v18_v4 }
   0xe   :  { %v21_v7 = vmul.f32 0.125, %v20_v6 }
  0x10   :  { %v22_v8 = vsub.f32 %v14_v0, %v21_v7 }
  0x12   :  { %v23_v9 = vmul.f32 %v22_v8, %v22_v8 }
  0x14   :  { %v24_v10 = vrot.slane %v23_v9, 4 }
  0x16   :  { %v25_v11 = vadd.f32 %v24_v10, %v23_v9 }
  0x18   :  { %v26_v12 = vrot.slane %v25_v11, 2 }
  0x1a   :  { %v27_v13 = vadd.f32 %v26_v12, %v25_v11 }
  0x1c   :  { %v28_v14 = vrot.slane %v27_v13, 1 }
  0x1e   :  { %v29_v15 = vadd.f32 %v28_v14, %v27_v13 }
  0x20   :  { %30 = vrot.lane.b32.xlu0 %v29_v15, %s70_s14 }
  0x28   :  { %32 = vrot.lane.b32.xlu0 %v29_v15, %s71_s15 }
  0x92   :  { %v31_v18 = vpop.permute.xlu0 %30 }
  0x9a   :  { %v33_v20 = vpop.permute.xlu0 %32 }
  0x9b   :  { %v38_v21 = vsel %vm37_vm0, %v31_v18, %v33_v20 }
  0x9c   :  { %v39_v22 = vadd.f32 %v38_v21, %v29_v15 }
  0x9e   :  { %v40_v23 = vmul.f32 0.14285715, %v39_v22 }
  0xa0   :  { %68 = vrsqrt.f32 %v40_v23  ;;  %vm47_vm2 = vweird.f32 %v40_v23 }
  0xa6   :  { %v69_v24 = vpop.eup %68 }
  0xa7   :  { %v42_v25 = vmul.f32 %v69_v24, %v40_v23  ;;  %vm48_vm1 = vweird.f32 %v69_v24 }
  0xa8   :  { %vm49_vm3 = vmor %vm47_vm2, %vm48_vm1 }
  0xa9   :  { %v43_v26 = vmul.f32 %v69_v24, %v42_v25 }
  0xab   :  { %v44_v27 = vmul.f32 0.5, %v43_v26 }
  0xad   :  { %v45_v28 = vsub.f32 1.5, %v44_v27 }
  0xaf   :  { %v46_v30 = vmul.f32 %v69_v24, %v45_v28 }
  0xb1   :  { %v50_v31 = vsel %vm49_vm3, %v69_v24, %v46_v30 }
  0xb2   :  { %v52_v32 = vmul.f32 %v51_v29, %v50_v31 }
  0xb4   :  { %v53_v34 = vperm.slane %v52_v32, 0 }
  0xb6   :  { %v54_v35 = vmul.f32 %v53_v34, %v22_v8 }
  0xb8   :  { %v59_v36 = vadd.f32 %v67_v33, %v54_v35 }
  0xba   :  { %60 = vst [vmem:[%s107_s3] sm:$0xff] %v59_v36 }

</bundles_post_ra>
